<compile_context>
chip_gen: v6e
topology: v6e:2x2x1
jax: 0.10.0
libtpu: 0.0.40
codegen_flags: <defaults>
</compile_context>

<pallas_src>
import functools

import jax
import jax.numpy as jnp
from jax.experimental import pallas as pl
from jax.experimental.pallas import tpu as pltpu


def mlp_kernel(x_ref, w1_ref, b1_ref, wo_ref, bo_ref, o_ref):
    x = x_ref[...]                                               # (Bt, D)
    # fused hidden layer: (Bt, D) @ (D, Hp) + (1, Hp), Hp = 256 lane-aligned
    h = jnp.tanh(
        jnp.dot(x, w1_ref[...], preferred_element_type=jnp.float32) + b1_ref[...]
    )
    # output layer: (Bt, Hp) @ (Hp, O) + (1, O)  (padded rows of Wo are zero)
    z = jnp.dot(h, wo_ref[...], preferred_element_type=jnp.float32) + bo_ref[...]
    o_ref[...] = jax.nn.sigmoid(z).astype(o_ref.dtype)


def _round_up(n, m):
    return ((n + m - 1) // m) * m


def prepare_params(params, lane=128):
    """One-time preprocessing of torch-convention params: fuse the two hidden
    branches, transpose to (in, out) layout, and zero-pad hidden dim to a
    multiple of 128 lanes.  Call once at init, NOT per forward."""
    w1a, b1a = params["w1a"], params["b1a"]            # (H1, D), (H1,)
    w1b, b1b = params["w1b"], params["b1b"]            # (H2, D), (H2,)
    wo, bo = params["wo"], params["bo"]                # (O, H1+H2), (O,)

    H1, D = w1a.shape
    H2 = w1b.shape[0]
    O = wo.shape[0]
    H = H1 + H2
    Hp = _round_up(H, lane)                            # 200 -> 256

    w1 = jnp.concatenate([w1a, w1b], axis=0).T         # (D, H)
    b1 = jnp.concatenate([b1a, b1b], axis=0)[None, :]  # (1, H)
    wo_t = wo.T                                        # (H, O)  (concat order matches)

    w1p = jnp.zeros((D, Hp), jnp.float32).at[:, :H].set(w1)
    b1p = jnp.zeros((1, Hp), jnp.float32).at[:, :H].set(b1)
    wop = jnp.zeros((Hp, O), jnp.float32).at[:H, :].set(wo_t)
    bop = bo[None, :]                                  # (1, O)

    prep = {"w1": w1p, "b1": b1p, "wo": wop, "bo": bop}
    return jax.tree_util.tree_map(jax.block_until_ready, prep)


@functools.partial(jax.jit, static_argnames=("max_bt",))
def net_forward(x, prep, *, max_bt=512):
    """x: (B, num_inputs) float32. prep: output of prepare_params.

    Batch-tiled: x/out are blocked (Bt, D)/(Bt, O) over a 1-D "parallel" grid,
    while the four weight/bias operands use constant (0, 0) index_maps so they
    stay VMEM-resident across all grid steps.  For small B this degenerates to
    a single grid step (no added overhead vs. a gridless call).
    """
    B, D = x.shape
    Hp, O = prep["wo"].shape

    # Batch tile: multiple of 8 (f32 sublane), capped so the per-step footprint
    # (x tile + h intermediate + out tile) stays tiny even on v7x's 64 MiB VMEM.
    Bt = min(_round_up(B, 8), max_bt)
    Bp = _round_up(B, Bt)
    if Bp != B:
        x = jnp.zeros((Bp, D), x.dtype).at[:B].set(x)

    grid = (Bp // Bt,)

    weight_bytes = 4 * (D * Hp + Hp + Hp * O + O)
    cost = pl.CostEstimate(
        flops=2 * Bp * (D * Hp + Hp * O),
        transcendentals=Bp * (Hp + O),
        bytes_accessed=weight_bytes + 4 * Bp * (D + O),
    )

    out = pl.pallas_call(
        mlp_kernel,
        out_shape=jax.ShapeDtypeStruct((Bp, O), jnp.float32),
        grid=grid,
        in_specs=[
            pl.BlockSpec((Bt, D), lambda i: (i, 0)),    # x: batch-tiled
            pl.BlockSpec((D, Hp), lambda i: (0, 0)),    # W1: VMEM-resident
            pl.BlockSpec((1, Hp), lambda i: (0, 0)),    # b1: VMEM-resident
            pl.BlockSpec((Hp, O), lambda i: (0, 0)),    # Wo^T: VMEM-resident
            pl.BlockSpec((1, O), lambda i: (0, 0)),     # bo: VMEM-resident
        ],
        out_specs=pl.BlockSpec((Bt, O), lambda i: (i, 0)),
        compiler_params=pltpu.CompilerParams(dimension_semantics=("parallel",)),
        cost_estimate=cost,
    )(x, prep["w1"], prep["b1"], prep["wo"], prep["bo"])

    return out[:B] if Bp != B else out


def init_params(key, num_inputs, h1, h2, n_output):
    """Deterministic init mimicking torch.nn.Linear default (U[-1/sqrt(fan_in), ...])."""
    ks = jax.random.split(key, 6)

    def lin(kw, kb, fan_in, fan_out):
        bound = 1.0 / jnp.sqrt(fan_in)
        w = jax.random.uniform(kw, (fan_out, fan_in), jnp.float32, -bound, bound)
        b = jax.random.uniform(kb, (fan_out,), jnp.float32, -bound, bound)
        return w, b

    w1a, b1a = lin(ks[0], ks[1], num_inputs, h1)
    w1b, b1b = lin(ks[2], ks[3], num_inputs, h2)
    wo, bo = lin(ks[4], ks[5], h1 + h2, n_output)
    return {"w1a": w1a, "b1a": b1a, "w1b": w1b, "b1b": b1b, "wo": wo, "bo": bo}


def reference_forward(x, p):
    a = jnp.tanh(x @ p["w1a"].T + p["b1a"])
    b = jnp.tanh(x @ p["w1b"].T + p["b1b"])
    cat = jnp.concatenate([a, b], axis=-1)
    return jax.nn.sigmoid(cat @ p["wo"].T + p["bo"])


if __name__ == "__main__":
    key = jax.random.PRNGKey(0)
    k_param, k_x, k_x2 = jax.random.split(key, 3)

    batch = 8
    num_inputs = 32
    size_hidden_1 = 100
    size_hidden_2 = 100
    n_output = 4

    params = init_params(k_param, num_inputs, size_hidden_1, size_hidden_2, n_output)
    prep = prepare_params(params)                      # one-time weight prep

    # Small batch: degenerates to a single grid step (latency path).
    x = jax.random.normal(k_x, (batch, num_inputs), jnp.float32)
    out = jax.block_until_ready(net_forward(x, prep))
    ref = reference_forward(x, params)
    assert out.shape == (batch, n_output)
    assert jnp.allclose(out, ref, atol=1e-5, rtol=1e-5)

    # Larger, non-aligned batch: exercises the multi-step "parallel" batch grid
    # with VMEM-resident weights and the pad/slice path.
    big_batch = 1037
    xb = jax.random.normal(k_x2, (big_batch, num_inputs), jnp.float32)
    out_b = jax.block_until_ready(net_forward(xb, prep))
    ref_b = reference_forward(xb, params)
    assert out_b.shape == (big_batch, n_output)
    assert jnp.allclose(out_b, ref_b, atol=1e-5, rtol=1e-5)

    print("KERNEL_OK")
</pallas_src>

<mosaic_0001>
module attributes {stable_mosaic.version = 11 : i64} {
  func.func @mlp_kernel(%arg0: i32, %arg1: memref<8x32xf32, #tpu.memory_space<vmem>>, %arg2: memref<32x256xf32, #tpu.memory_space<vmem>>, %arg3: memref<1x256xf32, #tpu.memory_space<vmem>>, %arg4: memref<256x4xf32, #tpu.memory_space<vmem>>, %arg5: memref<1x4xf32, #tpu.memory_space<vmem>>, %arg6: memref<8x4xf32, #tpu.memory_space<vmem>>) attributes {dimension_semantics = [#tpu.dimension_semantics<parallel>], iteration_bounds = array<i64: 1>, scalar_prefetch = 0 : i64, scratch_operands = 0 : i64, tpu.core_type = #tpu.core_type<tc>, window_params = [{transform_indices = @transform_0, window_bounds = array<i64: 8, 32>}, {pipeline_mode = #tpu.pipeline_mode<synchronous>, transform_indices = @transform_1, window_bounds = array<i64: 32, 256>}, {pipeline_mode = #tpu.pipeline_mode<synchronous>, transform_indices = @transform_2, window_bounds = array<i64: 1, 256>}, {pipeline_mode = #tpu.pipeline_mode<synchronous>, transform_indices = @transform_3, window_bounds = array<i64: 256, 4>}, {pipeline_mode = #tpu.pipeline_mode<synchronous>, transform_indices = @transform_4, window_bounds = array<i64: 1, 4>}, {transform_indices = @transform_5, window_bounds = array<i64: 8, 4>}]} {
    %c0 = arith.constant 0 : index
    %c0_0 = arith.constant 0 : index
    %0 = vector.load %arg1[%c0, %c0_0] : memref<8x32xf32, #tpu.memory_space<vmem>>, vector<8x32xf32>
    %c0_1 = arith.constant 0 : index
    %c0_2 = arith.constant 0 : index
    %1 = vector.load %arg2[%c0_1, %c0_2] : memref<32x256xf32, #tpu.memory_space<vmem>>, vector<32x256xf32>
    %cst = arith.constant dense<0.000000e+00> : vector<8x256xf32>
    %2 = tpu.matmul %0, %1, %cst {dimension_numbers = #tpu.dot_dimension_numbers<[1], [0], [0], [1], [0, 0, 1, 1], [], []>} : vector<8x32xf32>, vector<32x256xf32>, vector<8x256xf32> -> vector<8x256xf32>
    %c0_3 = arith.constant 0 : index
    %c0_4 = arith.constant 0 : index
    %3 = vector.load %arg3[%c0_3, %c0_4] : memref<1x256xf32, #tpu.memory_space<vmem>>, vector<1x256xf32>
    %4 = vector.broadcast %3 : vector<1x256xf32> to vector<8x256xf32>
    %5 = arith.addf %2, %4 : vector<8x256xf32>
    %6 = math.tanh %5 : vector<8x256xf32>
    %c0_5 = arith.constant 0 : index
    %c0_6 = arith.constant 0 : index
    %7 = vector.load %arg4[%c0_5, %c0_6] : memref<256x4xf32, #tpu.memory_space<vmem>>, vector<256x4xf32>
    %cst_7 = arith.constant dense<0.000000e+00> : vector<8x4xf32>
    %8 = tpu.matmul %6, %7, %cst_7 {dimension_numbers = #tpu.dot_dimension_numbers<[1], [0], [0], [1], [0, 0, 1, 1], [], []>} : vector<8x256xf32>, vector<256x4xf32>, vector<8x4xf32> -> vector<8x4xf32>
    %c0_8 = arith.constant 0 : index
    %c0_9 = arith.constant 0 : index
    %9 = vector.load %arg5[%c0_8, %c0_9] : memref<1x4xf32, #tpu.memory_space<vmem>>, vector<1x4xf32>
    %10 = vector.broadcast %9 : vector<1x4xf32> to vector<8x4xf32>
    %11 = arith.addf %8, %10 : vector<8x4xf32>
    %12 = arith.negf %11 : vector<8x4xf32>
    %13 = math.exp %12 : vector<8x4xf32>
    %cst_10 = arith.constant 1.000000e+00 : f32
    %14 = vector.broadcast %cst_10 : f32 to vector<8x4xf32>
    %15 = arith.addf %14, %13 : vector<8x4xf32>
    %16 = arith.divf %14, %15 : vector<8x4xf32>
    %c0_11 = arith.constant 0 : index
    %c0_12 = arith.constant 0 : index
    %17 = vector.load %arg6[%c0_11, %c0_12] : memref<8x4xf32, #tpu.memory_space<vmem>>, vector<8x4xf32>
    tpu.vector_store %arg6[%c0_11, %c0_12], %16 {strides = array<i32>} : memref<8x4xf32, #tpu.memory_space<vmem>>, vector<8x4xf32>,
    return
  }
  func.func @transform_0(%arg0: i32) -> (i32, i32) {
    %c0_i32 = arith.constant 0 : i32
    %c0_i32_0 = arith.constant 0 : i32
    return %arg0, %c0_i32 : i32, i32
  }
  func.func @transform_1(%arg0: i32) -> (i32, i32) {
    %c0_i32 = arith.constant 0 : i32
    %c0_i32_0 = arith.constant 0 : i32
    %c0_i32_1 = arith.constant 0 : i32
    return %c0_i32, %c0_i32_0 : i32, i32
  }
  func.func @transform_2(%arg0: i32) -> (i32, i32) {
    %c0_i32 = arith.constant 0 : i32
    %c0_i32_0 = arith.constant 0 : i32
    %c0_i32_1 = arith.constant 0 : i32
    return %c0_i32, %c0_i32_0 : i32, i32
  }
  func.func @transform_3(%arg0: i32) -> (i32, i32) {
    %c0_i32 = arith.constant 0 : i32
    %c0_i32_0 = arith.constant 0 : i32
    %c0_i32_1 = arith.constant 0 : i32
    return %c0_i32, %c0_i32_0 : i32, i32
  }
  func.func @transform_4(%arg0: i32) -> (i32, i32) {
    %c0_i32 = arith.constant 0 : i32
    %c0_i32_0 = arith.constant 0 : i32
    %c0_i32_1 = arith.constant 0 : i32
    return %c0_i32, %c0_i32_0 : i32, i32
  }
  func.func @transform_5(%arg0: i32) -> (i32, i32) {
    %c0_i32 = arith.constant 0 : i32
    %c0_i32_0 = arith.constant 0 : i32
    return %arg0, %c0_i32 : i32, i32
  }
}

</mosaic_0001>

<bundles_post_ra>
// kernel: net_forward.1
= control target key start
LH: loop header
LB: loop body
LE: loop exit
PB: predicated region body
PF: predicated region fallthrough
CT: control target
= control target key end

     0   :  { %v286_v3 = vmov 0.0   ;;  %vm41_vm0 = vcmask 261120   ;;  %v31_v42 = vlaneseq  ;;  %vm233_vm1 = vcmask 31744   ;;  %s449_s1 = inlined_call_operand.vmem [shape: f32[32,256], index: 1, kind: input, shape index: {}]   ;;  %s450_s3 = inlined_call_operand.vmem [shape: f32[256,4], index: 3, kind: input, shape index: {}]   ;;  %s451_s0 = inlined_call_operand.vmem [shape: f32[8,32], index: 0, kind: input, shape index: {}]   ;;  %s452_s2 = inlined_call_operand.vmem [shape: f32[1,256], index: 2, kind: input, shape index: {}]   ;;  %s453_s4 = inlined_call_operand.vmem [shape: f32[1,4], index: 4, kind: input, shape index: {}]   ;;  %s454_s5 = inlined_call_operand.vmem [shape: f32[8,4], index: 5, kind: output, shape index: {}]  }
   0x1   :  { %v28_v0 = vld [vmem:[%s449_s1 + $0x38] sm:$0xff]  ;;  %v27_v1 = vld [vmem:[%s449_s1 + $0x30] sm:$0xff]  ;;  %v26_v2 = vld [vmem:[%s449_s1 + $0x28] sm:$0xff]  ;;  %109 = vmatprep.mubr.f32.mxu0 %v286_v3 }
   0x2   :  { %69 = vmatprep.subr.mxu0 %v28_v0  ;;  %v25_v4 = vld [vmem:[%s449_s1 + $0x20] sm:$0xff]  ;;  %v24_v5 = vld [vmem:[%s449_s1 + $0x18] sm:$0xff]  ;;  %v23_v6 = vld [vmem:[%s449_s1 + $0x10] sm:$0xff]  ;;  %v32_v43 = vshrl.u32 %v31_v42, 7 }
   0x3   :  { %70 = vmatpush1.msra.mxu0 %v27_v1  ;;  %v149_v7 = vld [vmem:[%s450_s3 + $0xf8] sm:$0xff]  ;;  %v148_v9 = vld [vmem:[%s450_s3 + $0xf0] sm:$0xff]  ;;  %v22_v10 = vld [vmem:[%s449_s1 + $0x8] sm:$0xff] }
   0x4   :  { %71 = vmatprep.subr.mxu0 %v26_v2  ;;  %v133_v8 = vld [vmem:[%s450_s3 + $0x78] sm:$0xff]  ;;  %242 = vmatprep.subr.mxu1 %v149_v7  ;;  %v132_v11 = vld [vmem:[%s450_s3 + $0x70] sm:$0xff]  ;;  %v21_v12 = vld [vmem:[%s449_s1] sm:$0xff]  ;;  %v33_v44 = vsub.s32 0, %v32_v43  ;;  %v37_v46 = vsub.s32 1, %v32_v43 }
   0x5   :  { %72 = vmatpush1.msra.mxu0 %v25_v4  ;;  %243 = vmatpush3.msra.mxu1 %v133_v8  ;;  %v147_v13 = vld [vmem:[%s450_s3 + $0xe8] sm:$0xff]  ;;  %v20_v14 = vld [vmem:[%s451_s0] sm:$0xff]  ;;  %v145_v18 = vld [vmem:[%s450_s3 + $0xd8] sm:$0xff] }
   0x6   :  { %73 = vmatprep.subr.mxu0 %v24_v5  ;;  %244 = vmatprep.subr.mxu1 %v148_v9  ;;  %v131_v15 = vld [vmem:[%s450_s3 + $0x68] sm:$0xff]  ;;  %v146_v16 = vld [vmem:[%s450_s3 + $0xe0] sm:$0xff]  ;;  %v129_v19 = vld [vmem:[%s450_s3 + $0x58] sm:$0xff] }
   0x7   :  { %74 = vmatpush1.msra.mxu0 %v23_v6  ;;  %245 = vmatpush3.msra.mxu1 %v132_v11  ;;  %v130_v17 = vld [vmem:[%s450_s3 + $0x60] sm:$0xff]  ;;  %v144_v20 = vld [vmem:[%s450_s3 + $0xd0] sm:$0xff]  ;;  %v143_v22 = vld [vmem:[%s450_s3 + $0xc8] sm:$0xff] }
   0x8   :  { %75 = vmatprep.subr.mxu0 %v22_v10  ;;  %246 = vmatprep.subr.mxu1 %v147_v13  ;;  %v128_v21 = vld [vmem:[%s450_s3 + $0x50] sm:$0xff]  ;;  %v127_v23 = vld [vmem:[%s450_s3 + $0x48] sm:$0xff]  ;;  %v142_v24 = vld [vmem:[%s450_s3 + $0xc0] sm:$0xff] }
   0x9   :  { %76 = vmatpush1.msra.mxu0 %v21_v12  ;;  %247 = vmatpush3.msra.mxu1 %v131_v15  ;;  %v126_v25 = vld [vmem:[%s450_s3 + $0x40] sm:$0xff]  ;;  %v141_v26 = vld [vmem:[%s450_s3 + $0xb8] sm:$0xff]  ;;  %v140_v28 = vld [vmem:[%s450_s3 + $0xb0] sm:$0xff] }
   0xa   :  { %239 = vmatmul.mubr.msk.f32.vlgmr.msra.gmra.mxu0 %vm41_vm0, %v20_v14  ;;  %248 = vmatprep.subr.mxu1 %v146_v16  ;;  %v125_v27 = vld [vmem:[%s450_s3 + $0x38] sm:$0xff]  ;;  %v124_v29 = vld [vmem:[%s450_s3 + $0x30] sm:$0xff]  ;;  %v139_v30 = vld [vmem:[%s450_s3 + $0xa8] sm:$0xff] }
   0xb   :  { %249 = vmatpush3.msra.mxu1 %v130_v17  ;;  %v123_v31 = vld [vmem:[%s450_s3 + $0x28] sm:$0xff]  ;;  %v138_v32 = vld [vmem:[%s450_s3 + $0xa0] sm:$0xff]  ;;  %v137_v34 = vld [vmem:[%s450_s3 + $0x98] sm:$0xff] }
   0xc   :  { %250 = vmatprep.subr.mxu1 %v145_v18  ;;  %v122_v33 = vld [vmem:[%s450_s3 + $0x20] sm:$0xff]  ;;  %v121_v35 = vld [vmem:[%s450_s3 + $0x18] sm:$0xff]  ;;  %v136_v36 = vld [vmem:[%s450_s3 + $0x90] sm:$0xff] }
   0xd   :  { %251 = vmatpush3.msra.mxu1 %v129_v19  ;;  %v120_v37 = vld [vmem:[%s450_s3 + $0x10] sm:$0xff]  ;;  %v135_v38 = vld [vmem:[%s450_s3 + $0x88] sm:$0xff]  ;;  %v134_v40 = vld [vmem:[%s450_s3 + $0x80] sm:$0xff] }
   0xe   :  { %252 = vmatprep.subr.mxu1 %v144_v20  ;;  %v119_v39 = vld [vmem:[%s450_s3 + $0x8] sm:$0xff]  ;;  %v118_v41 = vld [vmem:[%s450_s3] sm:$0xff] }
   0xf   :  { %253 = vmatpush3.msra.mxu1 %v128_v21  ;;  %v29_v45 = vld [vmem:[%s452_s2] sm:$0x3] }
  0x10   :  { %254 = vmatprep.subr.mxu1 %v143_v22  ;;  %v34_v47 = vrot.slane %v29_v45, %v33_v44  ;;  %v38_v48 = vrot.slane %v29_v45, %v37_v46  ;;  %v240_v56 = vld [vmem:[%s453_s4] ss:$0 sm:$0xff] }
  0x11   :  { %255 = vmatpush3.msra.mxu1 %v127_v23 }
  0x12   :  { %256 = vmatprep.subr.mxu1 %v142_v24 }
  0x13   :  { %257 = vmatpush3.msra.mxu1 %v126_v25 }
  0x14   :  { %258 = vmatprep.subr.mxu1 %v141_v26 }
  0x15   :  { %259 = vmatpush3.msra.mxu1 %v125_v27 }
  0x16   :  { %260 = vmatprep.subr.mxu1 %v140_v28 }
  0x17   :  { %261 = vmatpush3.msra.mxu1 %v124_v29 }
  0x18   :  { %262 = vmatprep.subr.mxu1 %v139_v30 }
  0x19   :  { %263 = vmatpush3.msra.mxu1 %v123_v31 }
  0x1a   :  { %264 = vmatprep.subr.mxu1 %v138_v32 }
  0x1b   :  { %265 = vmatpush3.msra.mxu1 %v122_v33 }
  0x1c   :  { %266 = vmatprep.subr.mxu1 %v137_v34 }
  0x1d   :  { %267 = vmatpush3.msra.mxu1 %v121_v35 }
  0x1e   :  { %268 = vmatprep.subr.mxu1 %v136_v36 }
  0x1f   :  { %269 = vmatpush3.msra.mxu1 %v120_v37 }
  0x20   :  { %270 = vmatprep.subr.mxu1 %v135_v38 }
  0x21   :  { %271 = vmatpush3.msra.mxu1 %v119_v39 }
  0x22   :  { %272 = vmatprep.subr.mxu1 %v134_v40 }
  0x23   :  { %273 = vmatpush3.msra.mxu1 %v118_v41 }
  0xca   :  { %v111_v49 = vpop.f32.mrf.mxu0 }
  0xcb   :  { %v112_v50 = vadd.f32 %v111_v49, %v34_v47 }
  0xcc   :  { %v113_v51 = vpop.f32.mrf.mxu0 }
  0xcd   :  { %v114_v52 = vadd.f32 %v113_v51, %v38_v48 }
  0xcf   :  { %278 = vtanh.f32 %v114_v52 }
  0xd0   :  { %280 = vtanh.f32 %v112_v50 }
  0xdc   :  { %v279_v53 = vpop.eup %278 }
  0xdd   :  { %v281_v54 = vpop.eup %280  ;;  %221 = vmatprep.mubr.f32.mxu1 %v279_v53 }
  0xde   :  { %222 = vmatmul.mubr.f32.vlgmr.msra.gmra.mxu1 %v281_v54 }
 0x19e   :  { %v274_v55 = vpop.f32.mrf.mxu1 }
 0x1a0   :  { %v275_v57 = vpop.f32.mrf.mxu1 }
 0x1a1   :  { %v276_v58 = vadd.f32 %v275_v57, %v274_v55 }
 0x1a3   :  { %v224_v59 = vadd.f32 %v276_v58, %v240_v56 }
 0x1a5   :  { %v241_v60 = vmul.f32 -1.442695, %v224_v59 }
 0x1a7   :  { %282 = vpow2.f32 %v241_v60 }
 0x1b4   :  { %v283_v61 = vpop.eup %282 }
 0x1b5   :  { %v230_v62 = vadd.f32 1.0, %v283_v61 }
 0x1b7   :  { %284 = vrcp.f32 %v230_v62 }
 0x1c4   :  { %v285_v63 = vpop.eup %284 }
 0x1c5   :  { %234 = vst.msk [vmem:[%s454_s5] sm:$0xff] %vm233_vm1, %v285_v63 }

</bundles_post_ra>
